<compile_context>
chip_gen: v7x
topology: tpu7x:2x2x1
jax: 0.10.0
libtpu: 0.0.40
codegen_flags: <defaults>
</compile_context>

<pallas_src>
import functools
import math
from dataclasses import dataclass

import jax
import jax.numpy as jnp
from jax import lax
from jax.experimental import pallas as pl
from jax.experimental.pallas import tpu as pltpu


# ----------------------------------------------------------------------------
# Config (mirrors the PyTorch ModelConfig fields that are actually used).
# ----------------------------------------------------------------------------
@dataclass
class ModelConfig:
    vocab_size: int = 10000
    dim_model: int = 1024
    dim_ff: int = 1024
    num_layers: int = 6
    num_heads: int = 8
    dropout: float = 0.1
    batch_size: int = 64
    max_len: int = 1024
    pad_token_id: int = 0
    seed: int = 218


# Finite "masked" bias (avoids NaN rows that -inf produces when a query row is
# fully masked; numerically identical to -inf for any row with >=1 valid key).
_MASK_BIAS = -1e30


def _sublane_align(dtype) -> int:
    """Sublane alignment for a dtype: 8 (f32), 16 (bf16), 32 (int8)."""
    return max(8, 32 // jnp.dtype(dtype).itemsize)


def _pick_tile(dim: int, pref: int, align: int) -> int:
    """Largest `align`-multiple divisor of `dim` that is <= pref, else full dim.

    NOTE: test / production shapes (D=1024, S=1024, B*S multiples of 512) all
    divide cleanly; a cdiv grid with masked remainders would be needed for
    arbitrary non-divisible dims.
    """
    if dim <= pref:
        return dim
    t = (pref // align) * align
    while t >= align:
        if dim % t == 0:
            return t
        t -= align
    return dim


# ----------------------------------------------------------------------------
# Tiled linear (y = x @ w + b) kernel.
# ----------------------------------------------------------------------------
def _linear_kernel(x_ref, w_ref, b_ref, o_ref, acc_ref):
    @pl.when(pl.program_id(2) == 0)
    def _():
        acc_ref[...] = jnp.zeros_like(acc_ref)

    # Native-dtype MXU operands (bf16 inputs take the fast bf16 path);
    # accumulation stays f32 via preferred_element_type.
    acc_ref[...] += jnp.dot(x_ref[...], w_ref[...],
                            preferred_element_type=jnp.float32)

    @pl.when(pl.program_id(2) == pl.num_programs(2) - 1)
    def _():
        o_ref[...] = (acc_ref[...] + b_ref[...].astype(jnp.float32)
                      ).astype(o_ref.dtype)


def linear(x2d: jax.Array, w: jax.Array, b: jax.Array,
           *, tm: int = 512, tn: int = 512, tk: int = 512) -> jax.Array:
    """x2d: (M, K), w: (K, N), b: (N,) -> (M, N)."""
    M, K = x2d.shape
    K2, N = w.shape
    assert K == K2 and b.shape == (N,)

    tm = _pick_tile(M, tm, _sublane_align(x2d.dtype))
    tn = _pick_tile(N, tn, 128)
    tk = _pick_tile(K, tk, 128)
    grid = (M // tm, N // tn, K // tk)
    b2d = b.reshape(1, N)

    return pl.pallas_call(
        _linear_kernel,
        out_shape=jax.ShapeDtypeStruct((M, N), x2d.dtype),
        grid_spec=pltpu.PrefetchScalarGridSpec(
            num_scalar_prefetch=0,
            grid=grid,
            in_specs=[
                pl.BlockSpec((tm, tk), lambda i, j, k: (i, k)),
                pl.BlockSpec((tk, tn), lambda i, j, k: (k, j)),
                pl.BlockSpec((1, tn), lambda i, j, k: (0, j)),
            ],
            out_specs=pl.BlockSpec((tm, tn), lambda i, j, k: (i, j)),
            scratch_shapes=[pltpu.VMEM((tm, tn), jnp.float32)],
        ),
        compiler_params=pltpu.CompilerParams(
            dimension_semantics=("parallel", "parallel", "arbitrary")),
    )(x2d, w, b2d)


# ----------------------------------------------------------------------------
# Fused attention core: rotary(q,k) -> scores -> +mask bias -> softmax -> @ v.
# Grid = (batch, head, query_tile); q/k/v are head-column slices of xqkv and
# the output is written straight into (B, S, D) layout.
# ----------------------------------------------------------------------------
def _mha_attn_kernel(q_ref, k_ref, v_ref, cos_ref, sin_ref, *rest, scale):
    if len(rest) == 2:
        bias_ref, o_ref = rest
    else:
        bias_ref = None
        (o_ref,) = rest

    tq = q_ref.shape[0]
    half = cos_ref.shape[-1]
    cos = cos_ref[...].astype(jnp.float32)          # (1, half) -- per-head row
    sin = sin_ref[...].astype(jnp.float32)

    q = q_ref[...].astype(jnp.float32)              # (tq, dh)
    k = k_ref[...].astype(jnp.float32)              # (S,  dh)

    # Rotary: complex multiply (r + i*im) * (cos + i*sin) -> [real, imag].
    # Softmax scale folded into q here (tq*dh mults instead of tq*S later).
    q_r, q_i = q[:, :half], q[:, half:]
    k_r, k_i = k[:, :half], k[:, half:]
    qa = (q_r * cos - q_i * sin) * scale
    qb = (q_r * sin + q_i * cos) * scale
    ka = k_r * cos - k_i * sin
    kb = k_r * sin + k_i * cos

    # Score matmul split over the two halves (avoids a lane-axis concat).
    # Operands stay in the model dtype (bf16 models -> native bf16 MXU);
    # accumulation is f32.
    mm_dtype = q_ref.dtype
    dims = (((1,), (1,)), ((), ()))
    s = lax.dot_general(qa.astype(mm_dtype), ka.astype(mm_dtype), dims,
                        preferred_element_type=jnp.float32)
    s = s + lax.dot_general(qb.astype(mm_dtype), kb.astype(mm_dtype), dims,
                            preferred_element_type=jnp.float32)

    if bias_ref is not None:
        # bias_ref is the full (S, S) (or per-batch/head) slab, VMEM-resident;
        # slice the query-row window for this grid step.
        q0 = pl.multiple_of(pl.program_id(2) * tq, tq)
        s = s + bias_ref[pl.ds(q0, tq), :].astype(jnp.float32)

    # Softmax.  TODO(synk): attention-weight dropout is identity (eval mode);
    # training-mode RNG dropout is not implemented.
    m = jnp.max(s, axis=-1, keepdims=True)
    p = jnp.exp(s - m)
    l = jnp.sum(p, axis=-1, keepdims=True)

    out = jnp.dot(p.astype(v_ref.dtype), v_ref[...],
                  preferred_element_type=jnp.float32)
    # Normalize the (tq, dh) output instead of the (tq, S) probabilities;
    # reciprocal runs on the EUP slot.
    out = out * pl.reciprocal(l, approx=True)
    o_ref[...] = out.astype(o_ref.dtype)


def _attention(xqkv, cos, sin, bias, scale, num_heads, *, tq_pref: int = 256):
    """xqkv: (B, S, 3D); cos/sin: (H, 1, dh/2); bias: (GB, GH, S, S) or None.

    Returns attention output already laid out as (B, S, D).
    """
    B, S, D3 = xqkv.shape
    D = D3 // 3
    H = num_heads
    dh = D // H
    half = cos.shape[-1]
    dtype = xqkv.dtype

    tq = _pick_tile(S, tq_pref, _sublane_align(dtype))
    nq = S // tq

    # q/k/v are column-block slices of xqkv: head h of q/k/v starts at column
    # block h / H+h / 2H+h (block width dh).  No wrapper-side head transpose.
    spec_q = pl.BlockSpec((None, tq, dh), lambda b, h, qi: (b, qi, h))
    spec_k = pl.BlockSpec((None, S, dh), lambda b, h, qi: (b, 0, H + h))
    spec_v = pl.BlockSpec((None, S, dh), lambda b, h, qi: (b, 0, 2 * H + h))
    spec_cs = pl.BlockSpec((None, 1, half), lambda b, h, qi: (h, 0, 0))
    out_spec = pl.BlockSpec((None, tq, dh), lambda b, h, qi: (b, qi, h))

    in_specs = [spec_q, spec_k, spec_v, spec_cs, spec_cs]
    args = [xqkv, xqkv, xqkv, cos, sin]
    if bias is not None:
        gb = 1 if bias.shape[0] > 1 else 0
        gh = 1 if bias.shape[1] > 1 else 0
        # Full (S, S) block with an index_map that is constant over the query
        # tiles (and over batch/head when the mask broadcasts) -> fetched once
        # and kept VMEM-resident instead of re-DMA'd per head.
        in_specs.append(pl.BlockSpec(
            (None, None, S, S),
            lambda b, h, qi: (b * gb, h * gh, 0, 0)))
        args.append(bias)

    return pl.pallas_call(
        functools.partial(_mha_attn_kernel, scale=scale),
        out_shape=jax.ShapeDtypeStruct((B, S, D), dtype),
        grid_spec=pltpu.PrefetchScalarGridSpec(
            num_scalar_prefetch=0,
            grid=(B, H, nq),
            in_specs=in_specs,
            out_specs=out_spec,
        ),
        compiler_params=pltpu.CompilerParams(
            dimension_semantics=("parallel", "parallel", "arbitrary"),
            vmem_limit_bytes=32 * 1024 * 1024),
    )(*args)


# ----------------------------------------------------------------------------
# Full forward pass.
# ----------------------------------------------------------------------------
def mha_forward(x, freqs_cis, mask, w_qkv, b_qkv, w_out, b_out, num_heads):
    B, S, D = x.shape
    H = num_heads
    dh = D // H
    half = dh // 2
    scale = dh ** (-0.5)

    # QKV projection; keep the (B, S, 3D) layout (no head split/transpose here).
    xqkv = linear(x.reshape(B * S, D), w_qkv, b_qkv).reshape(B, S, 3 * D)

    # Rotary tables, mirroring the reference apply_rotary_emb indexing exactly:
    # it is called on (B, H, S, dh) tensors and reads the dims as
    # (batch, seq, heads, dh), so the frequency index is the *head* index and
    # is broadcast over sequence positions.  -> compact (H, 1, half) tables.
    fc = freqs_cis[0, :H, :]                                    # (H, half)
    cos = jnp.real(fc).astype(jnp.float32).reshape(H, 1, half)
    sin = jnp.imag(fc).astype(jnp.float32).reshape(H, 1, half)

    # Additive mask bias (0 kept, large-negative masked), kept compact in the
    # mask's natural broadcast shape over (batch, head).
    bias = None
    if mask is not None:
        m = jnp.asarray(mask)
        if m.ndim < 4:
            m = m.reshape((1,) * (4 - m.ndim) + m.shape)
        m = jnp.broadcast_to(m, m.shape[:2] + (S, S))           # (GB, GH, S, S)
        bias = jnp.where(m, _MASK_BIAS, 0.0).astype(jnp.float32)

    out = _attention(xqkv, cos, sin, bias, scale, H)            # (B, S, D)
    return linear(out.reshape(B * S, D), w_out, b_out).reshape(B, S, D)


class MultiHeadAttention:
    """JAX/Pallas equivalent of the PyTorch MultiHeadAttention module."""

    def __init__(self, config: ModelConfig, key):
        assert config.dim_model % config.num_heads == 0
        self.num_heads = config.num_heads
        self.dim_model = config.dim_model
        # The PyTorch config has no dim_head field; derive it as dim_model / heads.
        self.dim_head = config.dim_model // config.num_heads
        self.scale = self.dim_head ** (-0.5)

        D = config.dim_model
        bound = 1.0 / math.sqrt(D)
        k1, k2, k3, k4 = jax.random.split(key, 4)
        # Weights stored as (in, out); equivalent to torch Linear weight.T.
        self.w_qkv = jax.random.uniform(k1, (D, 3 * D), jnp.float32, -bound, bound)
        self.b_qkv = jax.random.uniform(k2, (3 * D,), jnp.float32, -bound, bound)
        self.w_out = jax.random.uniform(k3, (D, D), jnp.float32, -bound, bound)
        self.b_out = jax.random.uniform(k4, (D,), jnp.float32, -bound, bound)

    def __call__(self, x, freqs_cis, mask=None):
        return mha_forward(x, freqs_cis, mask, self.w_qkv, self.b_qkv,
                           self.w_out, self.b_out, self.num_heads)


# ----------------------------------------------------------------------------
# Pure-JAX reference (line-by-line mirror of the PyTorch forward).
# ----------------------------------------------------------------------------
def _reference_mha(x, freqs_cis, mask, w_qkv, b_qkv, w_out, b_out, num_heads):
    B, S, D = x.shape
    H = num_heads
    dh = D // H
    hp = jax.lax.Precision.HIGHEST

    xqkv = jnp.matmul(x, w_qkv, precision=hp) + b_qkv
    xq, xk, xv = jnp.split(xqkv, 3, axis=-1)

    def heads(t):
        return t.reshape(B, S, H, dh).transpose(0, 2, 1, 3)      # (B, H, S, dh)

    xq, xk, xv = heads(xq), heads(xk), heads(xv)

    def rope(t):  # mirrors apply_rotary_emb (dims read as batch, seq, heads, dh)
        b, h, s, d = t.shape
        fc = jnp.broadcast_to(freqs_cis[:, :h, :][:, :, None, :], (b, h, s, d // 2))
        tc = (t[..., : d // 2] + 1j * t[..., d // 2:]) * fc
        return jnp.concatenate([jnp.real(tc), jnp.imag(tc)], axis=-1)

    q, k = rope(xq), rope(xk)
    scores = jnp.einsum("bhqd,bhkd->bhqk", q, k, precision=hp) * (dh ** (-0.5))
    if mask is not None:
        scores = jnp.where(mask, -jnp.inf, scores)
    p = jax.nn.softmax(scores, axis=-1)
    out = jnp.einsum("bhqk,bhkd->bhqd", p, xv, precision=hp)
    out = out.transpose(0, 2, 1, 3).reshape(B, S, D)
    return jnp.matmul(out, w_out, precision=hp) + b_out


# ----------------------------------------------------------------------------
if __name__ == "__main__":
    key = jax.random.PRNGKey(0)
    # Small test shapes with dh = dim_model / heads = 128 (lane-dense blocks,
    # same head dim as the production config D=1024, H=8).
    cfg = ModelConfig(dim_model=256, num_heads=2, max_len=16, dropout=0.1)
    batch, seq = 2, 8
    D, H = cfg.dim_model, cfg.num_heads
    dh = D // H

    k_x, k_w = jax.random.split(key)
    x = jax.random.normal(k_x, (batch, seq, D), jnp.float32)

    # Precomputed rotary table: complex64 of shape (1, max_len, dh//2).
    pos = jnp.arange(cfg.max_len, dtype=jnp.float32)[:, None]
    inv_freq = 1.0 / (10000.0 ** (jnp.arange(0, dh // 2, dtype=jnp.float32) / (dh // 2)))
    angles = pos * inv_freq[None, :]
    freqs_cis = (jnp.cos(angles) + 1j * jnp.sin(angles)).astype(jnp.complex64)[None]

    # Causal mask: True == masked (as consumed by masked_fill).
    mask = (jnp.arange(seq)[None, :] > jnp.arange(seq)[:, None])[None, None]

    module = MultiHeadAttention(cfg, k_w)
    out = module(x, freqs_cis, mask)
    out = jax.block_until_ready(out)

    ref = _reference_mha(x, freqs_cis, mask, module.w_qkv, module.b_qkv,
                         module.w_out, module.b_out, H)

    assert out.shape == (batch, seq, D) and out.dtype == x.dtype
    assert bool(jnp.isfinite(out).all())
    assert jnp.allclose(out, ref, atol=2e-3, rtol=2e-3), "mismatch vs reference"

    print("KERNEL_OK")
</pallas_src>

<mosaic_0001>
module attributes {stable_mosaic.version = 11 : i64} {
  func.func @_linear_kernel(%arg0: i32, %arg1: i32, %arg2: i32, %arg3: memref<16x256xf32, #tpu.memory_space<vmem>>, %arg4: memref<256x384xf32, #tpu.memory_space<vmem>>, %arg5: memref<1x384xf32, #tpu.memory_space<vmem>>, %arg6: memref<16x384xf32, #tpu.memory_space<vmem>>, %arg7: memref<16x384xf32, #tpu.memory_space<vmem>>) attributes {dimension_semantics = [#tpu.dimension_semantics<parallel>, #tpu.dimension_semantics<parallel>, #tpu.dimension_semantics<arbitrary>], iteration_bounds = array<i64: 1, 2, 1>, scalar_prefetch = 0 : i64, scratch_operands = 1 : i64, tpu.core_type = #tpu.core_type<tc>, window_params = [{transform_indices = @transform_0, window_bounds = array<i64: 16, 256>}, {transform_indices = @transform_1, window_bounds = array<i64: 256, 384>}, {transform_indices = @transform_2, window_bounds = array<i64: 1, 384>}, {transform_indices = @transform_3, window_bounds = array<i64: 16, 384>}]} {
    %c0_i32 = arith.constant 0 : i32
    %0 = arith.cmpi eq, %arg2, %c0_i32 : i32
    %1 = arith.extui %0 : i1 to i32
    %c0_i32_0 = arith.constant 0 : i32
    %2 = arith.cmpi ne, %1, %c0_i32_0 : i32
    scf.if %2 {
      %cst_10 = arith.constant 0.000000e+00 : f32
      %12 = vector.broadcast %cst_10 : f32 to vector<16x384xf32>
      %c0_11 = arith.constant 0 : index
      %c0_12 = arith.constant 0 : index
      %13 = vector.load %arg7[%c0_11, %c0_12] : memref<16x384xf32, #tpu.memory_space<vmem>>, vector<16x384xf32>
      tpu.vector_store %arg7[%c0_11, %c0_12], %12 {strides = array<i32>} : memref<16x384xf32, #tpu.memory_space<vmem>>, vector<16x384xf32>,
    } else {
    }
    %c0 = arith.constant 0 : index
    %c0_1 = arith.constant 0 : index
    %3 = vector.load %arg7[%c0, %c0_1] : memref<16x384xf32, #tpu.memory_space<vmem>>, vector<16x384xf32>
    %c0_2 = arith.constant 0 : index
    %c0_3 = arith.constant 0 : index
    %4 = vector.load %arg3[%c0_2, %c0_3] : memref<16x256xf32, #tpu.memory_space<vmem>>, vector<16x256xf32>
    %c0_4 = arith.constant 0 : index
    %c0_5 = arith.constant 0 : index
    %5 = vector.load %arg4[%c0_4, %c0_5] : memref<256x384xf32, #tpu.memory_space<vmem>>, vector<256x384xf32>
    %cst = arith.constant dense<0.000000e+00> : vector<16x384xf32>
    %6 = tpu.matmul %4, %5, %cst {dimension_numbers = #tpu.dot_dimension_numbers<[1], [0], [0], [1], [0, 0, 1, 1], [], []>} : vector<16x256xf32>, vector<256x384xf32>, vector<16x384xf32> -> vector<16x384xf32>
    %7 = arith.addf %3, %6 : vector<16x384xf32>
    %c0_6 = arith.constant 0 : index
    %c0_7 = arith.constant 0 : index
    %8 = vector.load %arg7[%c0_6, %c0_7] : memref<16x384xf32, #tpu.memory_space<vmem>>, vector<16x384xf32>
    tpu.vector_store %arg7[%c0_6, %c0_7], %7 {strides = array<i32>} : memref<16x384xf32, #tpu.memory_space<vmem>>, vector<16x384xf32>,
    %c0_i32_8 = arith.constant 0 : i32
    %9 = arith.cmpi eq, %arg2, %c0_i32_8 : i32
    %10 = arith.extui %9 : i1 to i32
    %c0_i32_9 = arith.constant 0 : i32
    %11 = arith.cmpi ne, %10, %c0_i32_9 : i32
    scf.if %11 {
      %c0_10 = arith.constant 0 : index
      %c0_11 = arith.constant 0 : index
      %12 = vector.load %arg7[%c0_10, %c0_11] : memref<16x384xf32, #tpu.memory_space<vmem>>, vector<16x384xf32>
      %c0_12 = arith.constant 0 : index
      %c0_13 = arith.constant 0 : index
      %13 = vector.load %arg5[%c0_12, %c0_13] : memref<1x384xf32, #tpu.memory_space<vmem>>, vector<1x384xf32>
      %14 = vector.broadcast %13 : vector<1x384xf32> to vector<16x384xf32>
      %15 = arith.addf %12, %14 : vector<16x384xf32>
      %c0_14 = arith.constant 0 : index
      %c0_15 = arith.constant 0 : index
      %16 = vector.load %arg6[%c0_14, %c0_15] : memref<16x384xf32, #tpu.memory_space<vmem>>, vector<16x384xf32>
      tpu.vector_store %arg6[%c0_14, %c0_15], %15 {strides = array<i32>} : memref<16x384xf32, #tpu.memory_space<vmem>>, vector<16x384xf32>,
    } else {
    }
    return
  }
  func.func @transform_0(%arg0: i32, %arg1: i32, %arg2: i32) -> (i32, i32) {
    %c0_i32 = arith.constant 0 : i32
    return %arg0, %arg2 : i32, i32
  }
  func.func @transform_1(%arg0: i32, %arg1: i32, %arg2: i32) -> (i32, i32) {
    %c0_i32 = arith.constant 0 : i32
    return %arg2, %arg1 : i32, i32
  }
  func.func @transform_2(%arg0: i32, %arg1: i32, %arg2: i32) -> (i32, i32) {
    %c0_i32 = arith.constant 0 : i32
    %c0_i32_0 = arith.constant 0 : i32
    return %c0_i32, %arg1 : i32, i32
  }
  func.func @transform_3(%arg0: i32, %arg1: i32, %arg2: i32) -> (i32, i32) {
    %c0_i32 = arith.constant 0 : i32
    return %arg0, %arg1 : i32, i32
  }
}

</mosaic_0001>

<bundles_post_ra>
// kernel: tpu_custom_call.1
= control target key start
LH: loop header
LB: loop body
LE: loop exit
PB: predicated region body
PF: predicated region fallthrough
CT: control target
= control target key end

     0   :  { %8 = vsyncpa [#allocation4], 0  ;;  %s1458_s0 = inlined_call_operand.hbm [shape: f32[16,256], index: 0, kind: input, shape index: {}]   ;;  %s1459_s1 = inlined_call_operand.hbm [shape: f32[256,768], index: 1, kind: input, shape index: {}]   ;;  %s1460_s2 = inlined_call_operand.vmem [shape: f32[1,768], index: 2, kind: input, shape index: {}]   ;;  %s1461_s3 = inlined_call_operand.hbm [shape: f32[16,768], index: 3, kind: output, shape index: {}]  }
   0x1   :  { %9 = vsyncpa [#allocation7], 0 }
   0x2   :  { %11 = vsyncpa [#allocation7 + $0x1], 0 }
   0x3   :  { %12 = vsyncpa [#allocation5], 0 }
   0x4   :  { %14 = vsyncpa [#allocation5 + $0x1], 0  ;;  %s1127_s12 = smov 0   ;;  %s1129_s13 = smov 0  }
   0x5   :  { %s1131_s14 = smov 0   ;;  %s1133_s15 = smov 0  }
   0x6   :  { %s1135_s16 = smov 0   ;;  %s1137_s17 = smov 0  }
   0x7 LB: > { %s719_s18 = sadd.s32 4294967295, %s1094_s17   ;;  %s720_s19 = sadd.s32 4294967294, %s1094_s17   ;;  %s1094_s17 = sphi %s1137_s17, %s20_s17   ;;  %s1090_s16 = sphi %s1135_s16, %s1490_s16   ;;  %s1086_s15 = sphi %s1133_s15, %s1489_s15   ;;  %s1082_s14 = sphi %s1131_s14, %s1488_s14   ;;  %s1078_s13 = sphi %s1129_s13, %s1487_s13   ;;  %s1074_s12 = sphi %s1127_s12, %s1486_s12  }
   0x8   : > { %p83_p0 = scmp.ne.s32.totalorder %s1082_s14, %s1078_s13  ;;  %p84_p1 = scmp.eq.s32.totalorder %s1094_s17, 0 }
   0x9   : > { %p89_p2 = scmp.ne.s32.totalorder %s1078_s13, %s1074_s12  ;;  %p1165_p3 = scmp.eq.s32.totalorder %s719_s18, 0 }
   0xa   : > { %p141_p4 = scmp.eq.s32.totalorder %s719_s18, 1  ;;  %p1169_p5 = por %p84_p1, %p83_p0 }
   0xb   : > { %s1468_s21 = scalar_select %p1165_p3, 1, 0 }
   0xc   : > { %p147_p6 = scmp.eq.s32.totalorder %s720_s19, 1  ;;  %p1175_p7 = por %p1165_p3, %p89_p2 }
   0xd   : > { %p1179_p8 = por %p141_p4, %p83_p0  ;;  %p721_p10 = scmp.ge.s32.totalorder %s1094_s17, 1 }
   0xe   : > { %s1470_s23 = scalar_select %p1175_p7, 1, 0 }
   0xf   : > { %s1471_s24 = scalar_select %p1179_p8, 1, 0 }
  0x10   : > { %p1183_p9 = por %p147_p6, %p89_p2  ;;  %p154_p11 = scmp.lt.s32.totalorder %s1094_s17, 3 }
  0x11   : > { %s1096_s27 = smov [#allocation3]   ;;  %p890_p1 = scmp.lt.s32.totalorder %s1094_s17, 2 }
  0x12   : > { %s1472_s25 = scalar_select %p1183_p9, 1, 0 }
  0x13   : > { %p1189_p12 = pnand %p721_p10, %p154_p11  ;;  %s172_s28 = sshll.u32 %s1096_s27, 4  ;;  %s1193_s28 = int_to_ptr.vmem [resolvable:$true] %s172_s28 }
  0x14   : > { %p1207_p4 = pnand %p890_p1, %p1169_p5  ;;  %s35_s4 = sadd.s32 1, %s1090_s16 }
  0x15   : > { %s1473_s26 = scalar_select %p1189_p12, 1, 0 }
  0x16   : > { %p877_p13 = pneg %p1189_p12  ;;  %p1212_p6 = scmp.ge.s32.totalorder %s35_s4, 2 }
  0x17   : > { %s1475_s30 = scalar_select %p1207_p4, 1, 0 }
  0x18   : > { %p1201_p2 = pnand %p877_p13, %p1165_p3  ;;  %s950_s8 = scalar_lea.hbm %s1458_s0, 512 }
  0x19   : > { %s1476_s5 = scalar_select %p1212_p6, 1, 0 }
  0x1a   : > { %p951_p10 = scmp.ne.s32.totalorder %s1458_s0, %s950_s8  ;;  %p952_p11 = pneg %p1201_p2 }
  0x1b   : > { %p957_p1 = scmp.lt.u32.totalorder %s950_s8, %s1458_s0 }
  0x1c   : > { %p953_p13 = pnand %p952_p11, %p951_p10 }
  0x1e   : > { %p954_p5 = pneg %p953_p13 }
  0x20   : > { %p959_p0 = pnand %p957_p1, %p954_p5 }
  0x22   : > { %962 = shalt.err (!%p959_p0)
}
  0x23   : > { %s963_s19 = scalar_lea.vmem %s1193_s28, 512  ;;  %p971_p3 = scmp.lt.s32.totalorder %s1193_s28, %s1193_s28 }
  0x24   : > { %p964_p9 = scmp.ne.s32.totalorder %s1193_s28, %s963_s19  ;;  %p972_p12 = scmp.lt.s32.totalorder %s963_s19, %s963_s19 }
  0x26   : > { %p966_p8 = pnand %p964_p9, %p952_p11  ;;  %p973_p4 = por %p972_p12, %p971_p3 }
  0x28   : > { %p967_p7 = pneg %p966_p8 }
  0x2a   : > { %p974_p6 = pnand %p973_p4, %p967_p7 }
  0x2c   : > { %977 = shalt.err (!%p974_p6)
}
  0x2d   : > { %s1097_s22 = smov 256   ;;  %s1098_s27 = smov 16  }
  0x2e   : > { %880 = dma.hbm_to_vmem [thread:$0]  (!%p1201_p2), %s1458_s0, 512, %s1193_s28, [#allocation4], %s1097_s22, %s1097_s22, %s1098_s27  }
  0x2f   : > { %s186_s8 = sand.u32 1, %s1082_s14   ;;  %p1477_p3 = scmp.ne.s32.totalorder %s1476_s5, 0 }
  0x30   : > { %s866_s9 = smul.u32 768, %s186_s8  ;;  %s1478_s22 = sadd.s32 1, %s1082_s14 }
  0x31   : > { %s1492_s4 = smov (%p1477_p3, %s35_s4), 0  ;;  %s730_s11 = smul.u32 384, %s1090_s16 }
  0x32   : > { %s72_s10 = ssub.s32 %s1090_s16, %s1492_s4  ;;  %s190_s28 = scalar_lea.vmem [#allocation6], %s866_s9 }
  0x33   : > { %p74_p7 = scmp.eq.s32.totalorder %s72_s10, 0  ;;  %s1248_s20 = scalar_lea.hbm %s1459_s1, %s730_s11 }
  0x34   : > { %s200_s29 = sshll.u32 %s190_s28, 4  ;;  %s1257_s27 = scalar_lea.sflag [#allocation7], %s186_s8  ;;  %s1255_s29 = int_to_ptr.vmem [resolvable:$true] %s200_s29 }
  0x35   : > { %s1253_s5 = scalar_select %p74_p7, %s1082_s14, %s1478_s22  }
  0x36   : > { %s978_s6 = scalar_lea.hbm %s1248_s20, 12288  ;;  %p1479_p9 = scmp.ne.s32.totalorder %s1475_s30, 0 }
  0x37   : > { %p979_p8 = scmp.ne.s32.totalorder %s1248_s20, %s978_s6  ;;  %s983_s9 = scalar_lea.hbm %s1459_s1, 24576 }
  0x38   : > { %p980_p12 = pneg %p1479_p9  ;;  %p984_p4 = scmp.lt.u32.totalorder %s1248_s20, %s1459_s1 }
  0x39   : > { %p985_p6 = scmp.lt.u32.totalorder %s983_s9, %s978_s6  ;;  %p987_p11 = scmp.lt.u32.totalorder %s978_s6, %s1248_s20 }
  0x3a   : > { %p981_p0 = pnand %p980_p12, %p979_p8 }
  0x3b   : > { %p986_p10 = por %p985_p6, %p984_p4 }
  0x3c   : > { %p982_p2 = pneg %p981_p0 }
  0x3d   : > { %p988_p13 = por %p987_p11, %p986_p10 }
  0x3f   : > { %p989_p5 = pnand %p988_p13, %p982_p2 }
  0x41   : > { %992 = shalt.err (!%p989_p5)
}
  0x42   : > { %s993_s8 = scalar_lea.vmem %s1255_s29, 12288  ;;  %s1099_s19 = smov [#allocation6]  }
  0x43   : > { %p994_p1 = scmp.ne.s32.totalorder %s1255_s29, %s993_s8  ;;  %s998_s28 = sshll.u32 %s1099_s19, 4  ;;  %s999_s28 = int_to_ptr.vmem [resolvable:$false] %s998_s28 }
  0x44   : > { %s1000_s22 = scalar_lea.vmem %s999_s28, 24576  ;;  %p1001_p8 = scmp.lt.s32.totalorder %s1255_s29, %s999_s28 }
  0x45   : > { %p996_p3 = pnand %p994_p1, %p980_p12  ;;  %p1002_p0 = scmp.lt.s32.totalorder %s1000_s22, %s993_s8 }
  0x47   : > { %p997_p7 = pneg %p996_p3  ;;  %p1003_p4 = por %p1002_p0, %p1001_p8 }
  0x49   : > { %p1004_p6 = pnand %p1003_p4, %p997_p7 }
  0x4b   : > { %1007 = shalt.err (!%p1004_p6)
}
  0x4c   : > { %s1100_s6 = smov 768   ;;  %s1101_s7 = smov 384  }
  0x4d   : > { %s1102_s10 = smov 24   ;;  %p1480_p12 = scmp.ne.s32.totalorder %s1473_s26, 0 }
  0x4e   : > { %884 = dma.hbm_to_vmem [thread:$0]  (!%p1479_p9), %s1248_s20, 12288, %s1255_s29, %s1257_s27, %s1100_s6, %s1101_s7, %s1102_s10  }
  0x4f   : > { %220 = sbr.rel (%p1480_p12) target bundleno = 394 (0x18a), region = 32  ;;  %p1481_p2 = scmp.ne.s32.totalorder (!%p1480_p12), %s1468_s21, 0 }
  0x56   : > { %1061 = dma.done.wait (%p1481_p2), [#allocation4], 512  }
  0x57   : > { %1063 = vsyncadd (%p1481_p2), [#allocation4], 4294966784  ;;  %s1292_s9 = sand.u32 1, %s1078_s13   ;;  %p1482_p9 = scmp.ne.s32.totalorder %s1470_s23, 0 }
  0x58   : > { %s867_s11 = smul.u32 768, %s1292_s9  ;;  %s227_s18 = scalar_lea.sflag [#allocation7], %s1292_s9 }
  0x5a   : > { %s1296_s8 = scalar_lea.vmem [#allocation6], %s867_s11 }
  0x5b   : > { %1065 = dma.done.wait (%p1482_p9), %s227_s18, 12288  }
  0x5c   : > { %1067 = vsyncadd (%p1482_p9), %s227_s18, 4294955008  ;;  %v289_v0 = vld [vmem:[%s1296_s8 + $0x8] sm:$0xff]  ;;  %v292_v1 = vld [vmem:[%s1296_s8 + $0x20] sm:$0xff]  ;;  %s261_s20 = smul.u32 3, %s1086_s15  ;;  %p1483_p13 = scmp.ne.s32.totalorder %s1471_s24, 0 }
  0x5d   : > { %v288_v2 = vld [vmem:[%s1296_s8] sm:$0xff]  ;;  %v770_v3 = vpack.c.bf16 %v292_v1, %v289_v0  ;;  %v291_v4 = vld [vmem:[%s1296_s8 + $0x18] sm:$0xff]  ;;  %v298_v6 = vld [vmem:[%s1296_s8 + $0x50] sm:$0xff]  ;;  %s868_s30 = smul.u32 48, %s1292_s9  ;;  %s1103_s10 = smov [#allocation8]  }
  0x5e   : > { %v295_v5 = vld [vmem:[%s1296_s8 + $0x38] sm:$0xff]  ;;  %v772_v7 = vpack.c.bf16 %v291_v4, %v288_v2  ;;  %v294_v9 = vld [vmem:[%s1296_s8 + $0x30] sm:$0xff]  ;;  %v297_v10 = vld [vmem:[%s1296_s8 + $0x48] sm:$0xff]  ;;  %p262_p10 = scmp.lt.s32.totalorder %s261_s20, 5  ;;  %s731_s19 = smul.u32 384, %s1086_s15 }
  0x5f   : > { %v774_v8 = vpack.c.bf16 %v298_v6, %v295_v5  ;;  %v301_v11 = vld [vmem:[%s1296_s8 + $0x68] sm:$0xff]  ;;  %771 = vmatprep.subr.bf16.mxu0 %v770_v3  ;;  %v304_v12 = vld [vmem:[%s1296_s8 + $0x80] sm:$0xff]  ;;  %v776_v13 = vpack.c.bf16 %v297_v10, %v294_v9  ;;  %v303_v16 = vld [vmem:[%s1296_s8 + $0x78] sm:$0xff]  ;;  %s256_s29 = scalar_lea.vmem [#allocation8], %s868_s30  ;;  %s587_s15 = scalar_lea.sflag [#allocation5], %s1292_s9 }
  0x60   : > { %773 = vmatpush1.bf16.msra.mxu0 %v772_v7  ;;  %v778_v14 = vpack.c.bf16 %v304_v12, %v301_v11  ;;  %v300_v15 = vld [vmem:[%s1296_s8 + $0x60] sm:$0xff]  ;;  %v307_v17 = vld [vmem:[%s1296_s8 + $0x98] sm:$0xff]  ;;  %v310_v18 = vld [vmem:[%s1296_s8 + $0xb0] sm:$0xff]  ;;  %s1494_s20 = smov (!%p262_p10, %s261_s20), 5  ;;  %s603_s27 = sshll.u32 %s256_s29, 4  ;;  %s1404_s27 = int_to_ptr.vmem [resolvable:$true] %s603_s27 }
  0x61   : > { %775 = vmatprep.subr.bf16.mxu0 %v774_v8  ;;  %v780_v19 = vpack.c.bf16 %v303_v16, %v300_v15  ;;  %v782_v20 = vpack.c.bf16 %v310_v18, %v307_v17  ;;  %v306_v21 = vld [vmem:[%s1296_s8 + $0x90] sm:$0xff]  ;;  %v309_v22 = vld [vmem:[%s1296_s8 + $0xa8] sm:$0xff]  ;;  %v316_v24 = vld [vmem:[%s1296_s8 + $0xe0] sm:$0xff]  ;;  %s264_s26 = scalar_lea.vmem %s1460_s2, %s1494_s20  ;;  %s1409_s6 = scalar_lea.hbm %s1461_s3, %s731_s19 }
  0x62   : > { %v313_v23 = vld [vmem:[%s1296_s8 + $0xc8] sm:$0xff]  ;;  %v338_v25 = vld [vmem:[%s1296_s8 + $0x190] sm:$0xff]  ;;  %v784_v29 = vpack.c.bf16 %v309_v22, %v306_v21  ;;  %v312_v30 = vld [vmem:[%s1296_s8 + $0xc0] sm:$0xff]  ;;  %s1008_s7 = scalar_lea.vmem %s1404_s27, 768  ;;  %s1012_s11 = sshll.u32 %s1103_s10, 4  ;;  %s1013_s11 = int_to_ptr.vmem [resolvable:$false] %s1012_s11 }
  0x63   : > { %v341_v26 = vld [vmem:[%s1296_s8 + $0x1a8] sm:$0xff]  ;;  %v290_v27 = vld [vmem:[%s1296_s8 + $0x10] sm:$0xff]  ;;  %v315_v31 = vld [vmem:[%s1296_s8 + $0xd8] sm:$0xff]  ;;  %v786_v34 = vpack.c.bf16 %v316_v24, %v313_v23  ;;  %p1009_p11 = scmp.ne.s32.totalorder %s1404_s27, %s1008_s7  ;;  %s1014_s18 = scalar_lea.vmem %s1013_s11, 1536 }
  0x64   : > { %777 = vmatpush1.bf16.msra.mxu0 %v776_v13  ;;  %v293_v28 = vld [vmem:[%s1296_s8 + $0x28] sm:$0xff]  ;;  %v834_v32 = vpack.c.bf16 %v341_v26, %v338_v25  ;;  %v319_v35 = vld [vmem:[%s1296_s8 + $0xf8] sm:$0xff]  ;;  %v344_v36 = vld [vmem:[%s1296_s8 + $0x1c0] sm:$0xff]  ;;  %v788_v43 = vpack.c.bf16 %v315_v31, %v312_v30  ;;  %p1015_p3 = scmp.lt.s32.totalorder %s1404_s27, %s1013_s11  ;;  %p1016_p7 = scmp.lt.s32.totalorder %s1014_s18, %s1008_s7 }
  0x65   : > { %779 = vmatprep.subr.bf16.mxu0 %v778_v14  ;;  %v836_v33 = vpack.c.bf16 %v293_v28, %v290_v27  ;;  %v347_v37 = vld [vmem:[%s1296_s8 + $0x1d8] sm:$0xff]  ;;  %v322_v38 = vld [vmem:[%s1296_s8 + $0x110] sm:$0xff]  ;;  %v296_v40 = vld [vmem:[%s1296_s8 + $0x40] sm:$0xff]  ;;  %p1010_p5 = pnand %p1009_p11, %p1483_p13 }
  0x66   : > { %835 = vmatprep.subr.bf16.mxu1 %v834_v32  ;;  %v838_v39 = vpack.c.bf16 %v347_v37, %v344_v36  ;;  %v299_v41 = vld [vmem:[%s1296_s8 + $0x58] sm:$0xff]  ;;  %v350_v44 = vld [vmem:[%s1296_s8 + $0x1f0] sm:$0xff]  ;;  %v353_v45 = vld [vmem:[%s1296_s8 + $0x208] sm:$0xff]  ;;  %v790_v47 = vpack.c.bf16 %v322_v38, %v319_v35  ;;  %p1017_p8 = por %p1016_p7, %p1015_p3 }
  0x67   : > { %837 = vmatpush3.bf16.msra.mxu1 %v836_v33  ;;  %v840_v42 = vpack.c.bf16 %v299_v41, %v296_v40  ;;  %v302_v46 = vld [vmem:[%s1296_s8 + $0x70] sm:$0xff]  ;;  %v321_v49 = vld [vmem:[%s1296_s8 + $0x108] sm:$0xff]  ;;  %v842_v50 = vpack.c.bf16 %v353_v45, %v350_v44  ;;  %v328_v53 = vld [vmem:[%s1296_s8 + $0x140] sm:$0xff]  ;;  %p1011_p1 = pneg %p1010_p5 }
  0x68   : > { %781 = vmatpush1.bf16.msra.mxu0 %v780_v19  ;;  %839 = vmatprep.subr.bf16.mxu1 %v838_v39  ;;  %v318_v48 = vld [vmem:[%s1296_s8 + $0xf0] sm:$0xff]  ;;  %v305_v51 = vld [vmem:[%s1296_s8 + $0x88] sm:$0xff]  ;;  %v356_v54 = vld [vmem:[%s1296_s8 + $0x220] sm:$0xff] }
  0x69   : > { %783 = vmatprep.subr.bf16.mxu0 %v782_v20  ;;  %v325_v52 = vld [vmem:[%s1296_s8 + $0x128] sm:$0xff]  ;;  %v844_v55 = vpack.c.bf16 %v305_v51, %v302_v46  ;;  %v359_v56 = vld [vmem:[%s1296_s8 + $0x238] sm:$0xff]  ;;  %v792_v57 = vpack.c.bf16 %v321_v49, %v318_v48  ;;  %v324_v58 = vld [vmem:[%s1296_s8 + $0x120] sm:$0xff]  ;;  %p1018_p0 = pnand %p1017_p8, %p1011_p1 }
  0x6a   : > { %v846_v59 = vpack.c.bf16 %v359_v56, %v356_v54  ;;  %v308_v60 = vld [vmem:[%s1296_s8 + $0xa0] sm:$0xff]  ;;  %v311_v61 = vld [vmem:[%s1296_s8 + $0xb8] sm:$0xff]  ;;  %v794_v62 = vpack.c.bf16 %v328_v53, %v325_v52  ;;  %v362_v0 = vld [vmem:[%s1296_s8 + $0x250] sm:$0xff] }
  0x6b   : > { %841 = vmatpush3.bf16.msra.mxu1 %v840_v42  ;;  %v327_v63 = vld [vmem:[%s1296_s8 + $0x138] sm:$0xff]  ;;  %v365_v1 = vld [vmem:[%s1296_s8 + $0x268] sm:$0xff]  ;;  %v334_v3 = vld [vmem:[%s1296_s8 + $0x170] sm:$0xff]  ;;  %v848_v4 = vpack.c.bf16 %v311_v61, %v308_v60 }
  0x6c   : > { %785 = vmatpush1.bf16.msra.mxu0 %v784_v29  ;;  %843 = vmatprep.subr.bf16.mxu1 %v842_v50  ;;  %v331_v2 = vld [vmem:[%s1296_s8 + $0x158] sm:$0xff]  ;;  %v796_v5 = vpack.c.bf16 %v327_v63, %v324_v58  ;;  %v330_v6 = vld [vmem:[%s1296_s8 + $0x150] sm:$0xff]  ;;  %v850_v7 = vpack.c.bf16 %v365_v1, %v362_v0  ;;  %v317_v9 = vld [vmem:[%s1296_s8 + $0xe8] sm:$0xff] }
  0x6d   : > { %787 = vmatprep.subr.bf16.mxu0 %v786_v34  ;;  %v314_v8 = vld [vmem:[%s1296_s8 + $0xd0] sm:$0xff]  ;;  %v798_v10 = vpack.c.bf16 %v334_v3, %v331_v2  ;;  %v333_v11 = vld [vmem:[%s1296_s8 + $0x168] sm:$0xff]  ;;  %v368_v12 = vld [vmem:[%s1296_s8 + $0x280] sm:$0xff] }
  0x6e   : > { %v371_v13 = vld [vmem:[%s1296_s8 + $0x298] sm:$0xff]  ;;  %v337_v14 = vld [vmem:[%s1296_s8 + $0x188] sm:$0xff]  ;;  %v340_v15 = vld [vmem:[%s1296_s8 + $0x1a0] sm:$0xff]  ;;  %v852_v16 = vpack.c.bf16 %v317_v9, %v314_v8  ;;  %v800_v17 = vpack.c.bf16 %v333_v11, %v330_v6 }
  0x6f   : > { %845 = vmatpush3.bf16.msra.mxu1 %v844_v55  ;;  %v336_v18 = vld [vmem:[%s1296_s8 + $0x180] sm:$0xff]  ;;  %v854_v19 = vpack.c.bf16 %v371_v13, %v368_v12  ;;  %v323_v21 = vld [vmem:[%s1296_s8 + $0x118] sm:$0xff]  ;;  %v802_v22 = vpack.c.bf16 %v340_v15, %v337_v14  ;;  %v374_v24 = vld [vmem:[%s1296_s8 + $0x2b0] sm:$0xff] }
  0x70   : > { %789 = vmatpush1.bf16.msra.mxu0 %v788_v43  ;;  %847 = vmatprep.subr.bf16.mxu1 %v846_v59  ;;  %v320_v20 = vld [vmem:[%s1296_s8 + $0x100] sm:$0xff]  ;;  %v339_v23 = vld [vmem:[%s1296_s8 + $0x198] sm:$0xff]  ;;  %v377_v25 = vld [vmem:[%s1296_s8 + $0x2c8] sm:$0xff] }
  0x71   : > { %791 = vmatprep.subr.bf16.mxu0 %v790_v47  ;;  %v343_v26 = vld [vmem:[%s1296_s8 + $0x1b8] sm:$0xff]  ;;  %v346_v27 = vld [vmem:[%s1296_s8 + $0x1d0] sm:$0xff]  ;;  %v856_v28 = vpack.c.bf16 %v323_v21, %v320_v20  ;;  %v285_v29 = vld [vmem:[#allocation3 + $0x8] sm:$0xff]  ;;  %v804_v30 = vpack.c.bf16 %v339_v23, %v336_v18  ;;  %v858_v32 = vpack.c.bf16 %v377_v25, %v374_v24  ;;  %v559_v20 = vlaneseq }
  0x72   : > { %v342_v31 = vld [vmem:[%s1296_s8 + $0x1b0] sm:$0xff]  ;;  %v329_v34 = vld [vmem:[%s1296_s8 + $0x148] sm:$0xff]  ;;  %v806_v35 = vpack.c.bf16 %v346_v27, %v343_v26  ;;  %v380_v37 = vld [vmem:[%s1296_s8 + $0x2e0] sm:$0xff]  ;;  %525 = vmatprep.mubr.f32.mxu1 %v285_v29  ;;  %448 = vmatprep.mubr.f32.mxu0 %v285_v29 }
  0x73   : > { %849 = vmatpush3.bf16.msra.mxu1 %v848_v4  ;;  %v326_v33 = vld [vmem:[%s1296_s8 + $0x130] sm:$0xff]  ;;  %v345_v36 = vld [vmem:[%s1296_s8 + $0x1c8] sm:$0xff]  ;;  %v383_v38 = vld [vmem:[%s1296_s8 + $0x2f8] sm:$0xff]  ;;  %v560_v21 = vshrl.u32 %v559_v20, 7 }
  0x74   : > { %793 = vmatpush1.bf16.msra.mxu0 %v792_v57  ;;  %851 = vmatprep.subr.bf16.mxu1 %v850_v7  ;;  %v349_v39 = vld [vmem:[%s1296_s8 + $0x1e8] sm:$0xff]  ;;  %v352_v40 = vld [vmem:[%s1296_s8 + $0x200] sm:$0xff]  ;;  %v860_v41 = vpack.c.bf16 %v329_v34, %v326_v33  ;;  %v808_v42 = vpack.c.bf16 %v345_v36, %v342_v31  ;;  %v862_v43 = vpack.c.bf16 %v383_v38, %v380_v37  ;;  %v335_v45 = vld [vmem:[%s1296_s8 + $0x178] sm:$0xff] }
  0x75   : > { %795 = vmatprep.subr.bf16.mxu0 %v794_v62  ;;  %v332_v44 = vld [vmem:[%s1296_s8 + $0x160] sm:$0xff]  ;;  %v810_v46 = vpack.c.bf16 %v352_v40, %v349_v39  ;;  %v351_v48 = vld [vmem:[%s1296_s8 + $0x1f8] sm:$0xff]  ;;  %v358_v50 = vld [vmem:[%s1296_s8 + $0x230] sm:$0xff]  ;;  %v561_v33 = vsub.s32 0, %v560_v21  ;;  %v565_v34 = vsub.s32 1, %v560_v21 }
  0x76   : > { %v348_v47 = vld [vmem:[%s1296_s8 + $0x1e0] sm:$0xff]  ;;  %v355_v49 = vld [vmem:[%s1296_s8 + $0x218] sm:$0xff]  ;;  %v864_v51 = vpack.c.bf16 %v335_v45, %v332_v44  ;;  %v354_v54 = vld [vmem:[%s1296_s8 + $0x210] sm:$0xff] }
  0x77   : > { %853 = vmatpush3.bf16.msra.mxu1 %v852_v16  ;;  %v812_v52 = vpack.c.bf16 %v351_v48, %v348_v47  ;;  %v814_v53 = vpack.c.bf16 %v358_v50, %v355_v49  ;;  %v357_v55 = vld [vmem:[%s1296_s8 + $0x228] sm:$0xff]  ;;  %v364_v57 = vld [vmem:[%s1296_s8 + $0x260] sm:$0xff]  ;;  %v287_v60 = vld [vmem:[#allocation3 + $0x18] sm:$0xff] }
  0x78   : > { %797 = vmatpush1.bf16.msra.mxu0 %v796_v5  ;;  %855 = vmatprep.subr.bf16.mxu1 %v854_v19  ;;  %v361_v56 = vld [vmem:[%s1296_s8 + $0x248] sm:$0xff]  ;;  %v284_v58 = vld [vmem:[#allocation3] sm:$0xff]  ;;  %v816_v59 = vpack.c.bf16 %v357_v55, %v354_v54  ;;  %v363_v63 = vld [vmem:[%s1296_s8 + $0x258] sm:$0xff] }
  0x79   : > { %799 = vmatprep.subr.bf16.mxu0 %v798_v10  ;;  %v818_v61 = vpack.c.bf16 %v364_v57, %v361_v56  ;;  %v360_v62 = vld [vmem:[%s1296_s8 + $0x240] sm:$0xff]  ;;  %v367_v0 = vld [vmem:[%s1296_s8 + $0x278] sm:$0xff]  ;;  %v370_v1 = vld [vmem:[%s1296_s8 + $0x290] sm:$0xff] }
  0x7a   : > { %v286_v2 = vld [vmem:[#allocation3 + $0x10] sm:$0xff]  ;;  %v820_v3 = vpack.c.bf16 %v363_v63, %v360_v62  ;;  %v822_v4 = vpack.c.bf16 %v370_v1, %v367_v0  ;;  %v369_v6 = vld [vmem:[%s1296_s8 + $0x288] sm:$0xff]  ;;  %v376_v8 = vld [vmem:[%s1296_s8 + $0x2c0] sm:$0xff] }
  0x7b   : > { %857 = vmatpush3.bf16.msra.mxu1 %v856_v28  ;;  %v366_v5 = vld [vmem:[%s1296_s8 + $0x270] sm:$0xff]  ;;  %v373_v7 = vld [vmem:[%s1296_s8 + $0x2a8] sm:$0xff]  ;;  %v372_v11 = vld [vmem:[%s1296_s8 + $0x2a0] sm:$0xff] }
  0x7c   : > { %801 = vmatpush1.bf16.msra.mxu0 %v800_v17  ;;  %859 = vmatprep.subr.bf16.mxu1 %v858_v32  ;;  %v824_v9 = vpack.c.bf16 %v369_v6, %v366_v5  ;;  %v826_v10 = vpack.c.bf16 %v376_v8, %v373_v7  ;;  %v375_v12 = vld [vmem:[%s1296_s8 + $0x2b8] sm:$0xff]  ;;  %v382_v14 = vld [vmem:[%s1296_s8 + $0x2f0] sm:$0xff]  ;;  %v381_v18 = vld [vmem:[%s1296_s8 + $0x2e8] sm:$0xff] }
  0x7d   : > { %803 = vmatprep.subr.bf16.mxu0 %v802_v22  ;;  %v379_v13 = vld [vmem:[%s1296_s8 + $0x2d8] sm:$0xff]  ;;  %v828_v15 = vpack.c.bf16 %v375_v12, %v372_v11  ;;  %v378_v17 = vld [vmem:[%s1296_s8 + $0x2d0] sm:$0xff]  ;;  %v569_v22 = vsub.s32 2, %v560_v21  ;;  %v557_v23 = vld [vmem:[%s264_s26] sm:$0x7] }
  0x7e   : > { %v830_v16 = vpack.c.bf16 %v382_v14, %v379_v13  ;;  %v832_v19 = vpack.c.bf16 %v381_v18, %v378_v17  ;;  %v566_v36 = vrot.slane %v557_v23, %v565_v34 }
  0x7f   : > { %861 = vmatpush3.bf16.msra.mxu1 %v860_v41  ;;  %v570_v25 = vrot.slane %v557_v23, %v569_v22 }
  0x80   : > { %805 = vmatpush1.bf16.msra.mxu0 %v804_v30  ;;  %863 = vmatprep.subr.bf16.mxu1 %v862_v43 }
  0x81   : > { %807 = vmatprep.subr.bf16.mxu0 %v806_v35  ;;  %v562_v35 = vrot.slane %v557_v23, %v561_v33 }
  0x83   : > { %865 = vmatpush3.bf16.msra.mxu1 %v864_v51 }
  0x84   : > { %809 = vmatpush1.bf16.msra.mxu0 %v808_v42 }
  0x85   : > { %811 = vmatprep.subr.bf16.mxu0 %v810_v46 }
  0x86   : > { %526 = vmatmul.mubr.f32.vlgmr.msra.gmra.mrb[0].mxu1 %v284_v58 }
  0x87   : > { %530 = vmatprep.mubr.f32.mxu1 %v287_v60 }
  0x88   : > { %813 = vmatpush1.bf16.msra.mxu0 %v812_v52 }
  0x89   : > { %815 = vmatprep.subr.bf16.mxu0 %v814_v53 }
  0x8a   : > { %531 = vmatmul.mubr.f32.gmra.mrb[2].mxu1 %v286_v2 }
  0x8c   : > { %817 = vmatpush1.bf16.msra.mxu0 %v816_v59 }
  0x8d   : > { %819 = vmatprep.subr.bf16.mxu0 %v818_v61 }
  0x90   : > { %821 = vmatpush1.bf16.msra.mxu0 %v820_v3 }
  0x91   : > { %823 = vmatprep.subr.bf16.mxu0 %v822_v4 }
  0x94   : > { %825 = vmatpush1.bf16.msra.mxu0 %v824_v9 }
  0x95   : > { %827 = vmatprep.subr.bf16.mxu0 %v826_v10 }
  0x98   : > { %829 = vmatpush1.bf16.msra.mxu0 %v828_v15 }
  0x99   : > { %831 = vmatprep.subr.bf16.mxu0 %v830_v16 }
  0x9c   : > { %833 = vmatpush1.bf16.msra.mxu0 %v832_v19 }
  0x9f   : > { %449 = vmatmul.mubr.f32.vlgmr.msra.gmra.mrb[0].mxu0 %v284_v58 }
  0xa0   : > { %454 = vmatprep.mubr.f32.mxu0 %v287_v60 }
  0xa3   : > { %455 = vmatmul.mubr.f32.gmra.mrb[2].mxu0 %v286_v2 }
 0x159   : > { %v764_v24 = vpop.f32.mrb[0].mxu1 }
 0x15a   : > { %v765_v26 = vpop.f32.mrb[1].mxu1 }
 0x15b   : > { %v766_v27 = vadd.f32 %v765_v26, %v764_v24 }
 0x15d   : > { %v576_v28 = vadd.f32 %v766_v27, %v570_v25  ;;  %v767_v29 = vpop.f32.mrb[2].mxu1 }
 0x15e   : > { %v768_v30 = vpop.f32.mrb[3].mxu1 }
 0x15f   : > { %582 = vst [vmem:[%s256_s29 + $0x10] sm:$0xff] %v576_v28  ;;  %v769_v31 = vadd.f32 %v768_v30, %v767_v29 }
 0x161   : > { %v579_v32 = vadd.f32 %v769_v31, %v570_v25 }
 0x163   : > { %585 = vst [vmem:[%s256_s29 + $0x28] sm:$0xff] %v579_v32 }
 0x172   : > { %v450_v37 = vpop.f32.mrb[0].mxu0 }
 0x173   : > { %v574_v38 = vadd.f32 %v562_v35, %v450_v37  ;;  %v452_v39 = vpop.f32.mrb[1].mxu0 }
 0x174   : > { %v575_v40 = vadd.f32 %v566_v36, %v452_v39 }
 0x175   : > { %580 = vst [vmem:[%s256_s29] sm:$0xff] %v574_v38 }
 0x176   : > { %581 = vst [vmem:[%s256_s29 + $0x8] sm:$0xff] %v575_v40  ;;  %v456_v41 = vpop.f32.mrb[2].mxu0 }
 0x177   : > { %v577_v42 = vadd.f32 %v562_v35, %v456_v41  ;;  %v458_v43 = vpop.f32.mrb[3].mxu0 }
 0x178   : > { %v578_v44 = vadd.f32 %v566_v36, %v458_v43 }
 0x179   : > { %583 = vst [vmem:[%s256_s29 + $0x18] sm:$0xff] %v577_v42 }
 0x17a   : > { %584 = vst [vmem:[%s256_s29 + $0x20] sm:$0xff] %v578_v44 }
 0x17b   : > { %1021 = shalt.err (!%p1018_p0)
}
 0x17c   : > { %s1022_s8 = scalar_lea.hbm %s1409_s6, 768  ;;  %s1026_s23 = scalar_lea.hbm %s1461_s3, 1536 }
 0x17d   : > { %p1023_p4 = scmp.ne.s32.totalorder %s1409_s6, %s1022_s8  ;;  %p1027_p2 = scmp.lt.u32.totalorder %s1409_s6, %s1461_s3 }
 0x17e   : > { %p1028_p9 = scmp.lt.u32.totalorder %s1026_s23, %s1022_s8  ;;  %p1030_p11 = scmp.lt.u32.totalorder %s1022_s8, %s1409_s6 }
 0x17f   : > { %p1024_p6 = pnand %p1023_p4, %p1483_p13 }
 0x180   : > { %p1029_p10 = por %p1028_p9, %p1027_p2 }
 0x181   : > { %p1025_p12 = pneg %p1024_p6 }
 0x182   : > { %p1031_p5 = por %p1030_p11, %p1029_p10 }
 0x184   : > { %p1032_p1 = pnand %p1031_p5, %p1025_p12 }
 0x186   : > { %1035 = shalt.err (!%p1032_p1)
}
 0x187   : > { %s1104_s29 = smov 384   ;;  %s1105_s19 = smov 768  }
 0x188   : > { %s1106_s28 = smov 24  }
 0x189   : > { %875 = dma.vmem_to_hbm [thread:$0]  (%p1483_p13), %s1404_s27, 768, %s1409_s6, %s587_s15, %s1104_s29, %s1105_s19, %s1106_s28  }
 0x18a PF: > { %s618_s22 = sand.u32 1, %s1074_s12   ;;  %p1484_p3 = scmp.ne.s32.totalorder %s1472_s25, 0 }
 0x18b   : > { %p1485_p7 = scmp.ge.s32.totalorder %s1094_s17, 2  ;;  %s619_s7 = scalar_lea.sflag [#allocation5], %s618_s22 }
 0x18d   : > { %p886_p8 = pnand %p1485_p7, %p1484_p3 }
 0x18f   : > { %1069 = dma.done.wait (!%p886_p8), %s619_s7, 768  }
 0x190   : > { %1071 = vsyncadd (!%p886_p8), %s619_s7, 4294966528  ;;  %s20_s17 = sadd.s32 1, %s1094_s17   ;;  %s1486_s12 = smov %s1078_s13 }
 0x191   : > { %p17_p0 = scmp.ge.s32.totalorder %s20_s17, 4   ;;  %s1487_s13 = smov %s1082_s14 }
 0x192   : > { %s1488_s14 = smov %s1253_s5  ;;  %s1489_s15 = smov %s1090_s16 }
 0x193   : > { %s1490_s16 = smov %s1492_s4  ;;  %19 = sbr.rel (!%p17_p0) target bundleno = 7 (0x7), region = 94 }
 0x19a   :  { %624 = vsyncpa [#allocation4], 1 }
 0x19b   :  { %626 = vsyncpa [#allocation4 + $0x1], 1 }
 0x19c   :  { %627 = vsyncpa [#allocation7], 1 }
 0x19d   :  { %629 = vsyncpa [#allocation7 + $0x1], 1 }
 0x19e   :  { %630 = vsyncpa [#allocation5], 1 }
 0x19f   :  { %632 = vsyncpa [#allocation5 + $0x1], 1 }

</bundles_post_ra>
